<compile_context>
chip_gen: v5e
topology: v5e:2x2
jax: 0.10.0
libtpu: 0.0.40
codegen_flags: <defaults>
</compile_context>

<pallas_src>
import jax
import jax.numpy as jnp
from jax.experimental import pallas as pl
from jax.experimental.pallas import tpu as pltpu

I_IN = 2   # LSTM input size
H = 4      # LSTM hidden size


def _gate_stack(mf, mb):
    """Interleave per-gate column blocks of the two directions.

    mf, mb: (..., 4H) with PyTorch gate order [i, f, g, o] along the last axis.
    Returns (..., 8H) ordered [i_f, i_b, f_f, f_b, g_f, g_b, o_f, o_b].
    """
    parts = []
    for gi in range(4):
        parts.append(mf[..., gi * H:(gi + 1) * H])
        parts.append(mb[..., gi * H:(gi + 1) * H])
    return jnp.concatenate(parts, axis=-1)


def lstm_neureka_forward(x, params):
    """x: (B, T, I_IN) float32 -> (B, T) float32 (== torch out.squeeze() for B,T>1)."""
    B, T, _ = x.shape
    f32 = jnp.float32

    # ---------------- pack weights (tiny, once per call) ----------------
    wih_f = params["weight_ih_l0"].T.astype(f32)               # (I, 4H)
    wih_b = params["weight_ih_l0_reverse"].T.astype(f32)       # (I, 4H)
    whh_f = params["weight_hh_l0"].T.astype(f32)               # (H, 4H)
    whh_b = params["weight_hh_l0_reverse"].T.astype(f32)       # (H, 4H)
    b_f = (params["bias_ih_l0"] + params["bias_hh_l0"]).astype(f32)[None, :]
    b_b = (params["bias_ih_l0_reverse"] + params["bias_hh_l0_reverse"]).astype(f32)[None, :]

    zeros_i = jnp.zeros((I_IN, 4 * H), f32)
    zeros_h = jnp.zeros((H, 4 * H), f32)
    # Combined input weight: rows 0:I multiply x(t) (fwd-gate cols), rows I:2I multiply
    # x(T-1-t) (rev-gate cols).  Folds the per-step direction select into the matmul.
    wih_comb = _gate_stack(jnp.concatenate([wih_f, zeros_i], axis=0),
                           jnp.concatenate([zeros_i, wih_b], axis=0))    # (2I, 8H)
    # Block-diagonal recurrent weight: rows 0:H <- h_fwd, rows H:2H <- h_rev.
    whh_stack = _gate_stack(jnp.concatenate([whh_f, zeros_h], axis=0),
                            jnp.concatenate([zeros_h, whh_b], axis=0))   # (2H, 8H)
    b_stack = _gate_stack(b_f, b_b)                                      # (1, 8H)

    # sigmoid(z) = 0.5*(1 + tanh(z/2)): pre-scale i/f/o gate columns by 0.5 so one
    # tanh over the whole gate block serves every gate.
    gate_id = jnp.arange(8 * H) // (2 * H)                     # 0=i 1=f 2=g 3=o
    scale = jnp.where(gate_id == 2, 1.0, 0.5).astype(f32)
    wih_comb = wih_comb * scale
    whh_stack = whh_stack * scale
    b_stack = b_stack * scale

    wd_t = params["dense_weight"].astype(f32).T                # (2H, 1): [fwd H | rev H]
    bd = params["dense_bias"].astype(f32).reshape(1, 1)        # (1, 1)

    # time-major input, both time directions side by side: row index = t*B + b,
    # columns = [x(t) | x(T-1-t)]
    x_tm = jnp.transpose(x, (1, 0, 2)).astype(f32)                       # (T, B, I)
    x_comb = jnp.concatenate([x_tm, x_tm[::-1]], axis=-1).reshape(T * B, 2 * I_IN)

    # ------------------------------- kernel ----------------------------------
    def kernel(x_ref, wih_ref, whh_ref, b_ref, wd_ref, bd_ref, out_ref, hs_sc):
        # (1) input projection + bias for every timestep / both directions: 1 MXU pass.
        #     Kept as a value (vregs) -> no per-step VMEM reloads.
        xproj = (jnp.dot(x_ref[...], wih_ref[...], preferred_element_type=jnp.float32)
                 + b_ref[...])                                 # (T*B, 8H)

        whh = whh_ref[...]                                     # (2H, 8H), hoisted

        h = jnp.zeros((B, 2 * H), jnp.float32)                 # [h_fwd | h_rev]
        c = jnp.zeros((B, 2 * H), jnp.float32)

        # (2) fused bidirectional recurrence, fully unrolled; h/c live in vregs.
        #     NOTE: jnp.dot keeps the tiny recurrent matmul on the MXU; on v5e/v6e an
        #     unrolled VPU broadcast-MAC could shave MRF-pop latency if profiling
        #     shows it on the critical path.
        for s in range(T):
            r = T - 1 - s
            gates = xproj[s * B:(s + 1) * B, :] + jnp.dot(
                h, whh, preferred_element_type=jnp.float32)    # (B, 8H)
            t_all = jnp.tanh(gates)                            # single EUP pass, all gates
            i = t_all[:, 0:2 * H] * 0.5 + 0.5                  # sigmoid via tanh
            f = t_all[:, 2 * H:4 * H] * 0.5 + 0.5
            g = t_all[:, 4 * H:6 * H]
            o = t_all[:, 6 * H:8 * H] * 0.5 + 0.5
            c = f * c + i * g
            h = o * jnp.tanh(c)                                # 2nd (and last) EUP pass
            # stores are off the h/c critical path
            hs_sc[s * B:(s + 1) * B, 0:H] = h[:, 0:H]          # fwd hidden -> time s
            hs_sc[r * B:(r + 1) * B, H:2 * H] = h[:, H:2 * H]  # rev hidden -> time r

        # (3) deferred dense projection: one MXU pass + a single store
        out_ref[...] = (
            jnp.dot(hs_sc[...], wd_ref[...], preferred_element_type=jnp.float32)
            + bd_ref[...])

    vmem = pl.BlockSpec(memory_space=pltpu.MemorySpace.VMEM)
    out_flat = pl.pallas_call(
        kernel,
        out_shape=jax.ShapeDtypeStruct((T * B, 1), jnp.float32),
        in_specs=[vmem] * 6,
        out_specs=vmem,
        scratch_shapes=[pltpu.VMEM((T * B, 2 * H), jnp.float32)],  # per-step hiddens
    )(x_comb, wih_comb, whh_stack, b_stack, wd_t, bd)

    # TODO(synk): for large batches, tile B over a ("parallel",) grid axis so v7x's two
    # TensorCores are used; at B=2 a single invocation is optimal.
    return out_flat.reshape(T, B).T                            # (B, T)


# ---------------- pure-JAX reference (same math, for verification) ----------------
def lstm_neureka_ref(x, params):
    def run_dir(x_seq, wih, whh, b):
        B = x_seq.shape[0]

        def step(carry, x_t):
            h, c = carry
            gates = x_t @ wih.T + h @ whh.T + b
            i, f, g, o = jnp.split(gates, 4, axis=-1)
            i = jax.nn.sigmoid(i)
            f = jax.nn.sigmoid(f)
            g = jnp.tanh(g)
            o = jax.nn.sigmoid(o)
            c = f * c + i * g
            h = o * jnp.tanh(c)
            return (h, c), h

        init = (jnp.zeros((B, H), jnp.float32), jnp.zeros((B, H), jnp.float32))
        _, hs = jax.lax.scan(step, init, jnp.swapaxes(x_seq, 0, 1))
        return jnp.swapaxes(hs, 0, 1)                                # (B, T, H)

    hf = run_dir(x, params["weight_ih_l0"], params["weight_hh_l0"],
                 params["bias_ih_l0"] + params["bias_hh_l0"])
    hb = run_dir(x[:, ::-1, :], params["weight_ih_l0_reverse"],
                 params["weight_hh_l0_reverse"],
                 params["bias_ih_l0_reverse"] + params["bias_hh_l0_reverse"])[:, ::-1, :]
    lstm_out = jnp.concatenate([hf, hb], axis=-1)                    # (B, T, 2H)
    out = lstm_out @ params["dense_weight"].T + params["dense_bias"]  # (B, T, 1)
    return out[..., 0]


def init_params(key):
    k = 1.0 / jnp.sqrt(jnp.float32(H))
    names_shapes = [
        ("weight_ih_l0", (4 * H, I_IN)),
        ("weight_hh_l0", (4 * H, H)),
        ("bias_ih_l0", (4 * H,)),
        ("bias_hh_l0", (4 * H,)),
        ("weight_ih_l0_reverse", (4 * H, I_IN)),
        ("weight_hh_l0_reverse", (4 * H, H)),
        ("bias_ih_l0_reverse", (4 * H,)),
        ("bias_hh_l0_reverse", (4 * H,)),
        ("dense_weight", (1, 2 * H)),
        ("dense_bias", (1,)),
    ]
    keys = jax.random.split(key, len(names_shapes))
    return {
        name: jax.random.uniform(kk, shape, jnp.float32, minval=-k, maxval=k)
        for kk, (name, shape) in zip(keys, names_shapes)
    }


if __name__ == "__main__":
    key = jax.random.PRNGKey(0)
    k_x, k_p = jax.random.split(key)

    B, T = 2, 8
    x = jax.random.normal(k_x, (B, T, I_IN), jnp.float32)   # (batch, seq, features=2)
    params = init_params(k_p)

    fwd = jax.jit(lstm_neureka_forward)
    out = jax.block_until_ready(fwd(x, params))
    ref = jax.block_until_ready(lstm_neureka_ref(x, params))

    assert out.shape == (B, T), out.shape
    assert jnp.max(jnp.abs(out - ref)) < 1e-4, float(jnp.max(jnp.abs(out - ref)))
    print("KERNEL_OK")
</pallas_src>

<mosaic_0001>
module attributes {stable_mosaic.version = 11 : i64} {
  func.func @kernel(%arg0: memref<16x4xf32, #tpu.memory_space<vmem>>, %arg1: memref<4x32xf32, #tpu.memory_space<vmem>>, %arg2: memref<8x32xf32, #tpu.memory_space<vmem>>, %arg3: memref<1x32xf32, #tpu.memory_space<vmem>>, %arg4: memref<8x1xf32, #tpu.memory_space<vmem>>, %arg5: memref<1x1xf32, #tpu.memory_space<vmem>>, %arg6: memref<16x1xf32, #tpu.memory_space<vmem>>, %arg7: memref<16x8xf32, #tpu.memory_space<vmem>>) attributes {dimension_semantics = [], scalar_prefetch = 0 : i64, scratch_operands = 1 : i64, tpu.core_type = #tpu.core_type<tc>} {
    %c0 = arith.constant 0 : index
    %c0_0 = arith.constant 0 : index
    %0 = vector.load %arg0[%c0, %c0_0] : memref<16x4xf32, #tpu.memory_space<vmem>>, vector<16x4xf32>
    %c0_1 = arith.constant 0 : index
    %c0_2 = arith.constant 0 : index
    %1 = vector.load %arg1[%c0_1, %c0_2] : memref<4x32xf32, #tpu.memory_space<vmem>>, vector<4x32xf32>
    %cst = arith.constant dense<0.000000e+00> : vector<16x32xf32>
    %2 = tpu.matmul %0, %1, %cst {dimension_numbers = #tpu.dot_dimension_numbers<[1], [0], [0], [1], [0, 0, 1, 1], [], []>} : vector<16x4xf32>, vector<4x32xf32>, vector<16x32xf32> -> vector<16x32xf32>
    %c0_3 = arith.constant 0 : index
    %c0_4 = arith.constant 0 : index
    %3 = vector.load %arg3[%c0_3, %c0_4] : memref<1x32xf32, #tpu.memory_space<vmem>>, vector<1x32xf32>
    %4 = vector.broadcast %3 : vector<1x32xf32> to vector<16x32xf32>
    %5 = arith.addf %2, %4 : vector<16x32xf32>
    %c0_5 = arith.constant 0 : index
    %c0_6 = arith.constant 0 : index
    %6 = vector.load %arg2[%c0_5, %c0_6] : memref<8x32xf32, #tpu.memory_space<vmem>>, vector<8x32xf32>
    %cst_7 = arith.constant 0.000000e+00 : f32
    %7 = vector.broadcast %cst_7 : f32 to vector<2x8xf32>
    %cst_8 = arith.constant 0.000000e+00 : f32
    %8 = vector.broadcast %cst_8 : f32 to vector<2x8xf32>
    %9 = vector.extract_strided_slice %5 {offsets = [0, 0], sizes = [2, 32], strides = [1, 1]} : vector<16x32xf32> to vector<2x32xf32>
    %cst_9 = arith.constant dense<0.000000e+00> : vector<2x32xf32>
    %10 = tpu.matmul %7, %6, %cst_9 {dimension_numbers = #tpu.dot_dimension_numbers<[1], [0], [0], [1], [0, 0, 1, 1], [], []>} : vector<2x8xf32>, vector<8x32xf32>, vector<2x32xf32> -> vector<2x32xf32>
    %11 = arith.addf %9, %10 : vector<2x32xf32>
    %12 = math.tanh %11 : vector<2x32xf32>
    %13 = vector.extract_strided_slice %12 {offsets = [0, 0], sizes = [2, 8], strides = [1, 1]} : vector<2x32xf32> to vector<2x8xf32>
    %cst_10 = arith.constant 5.000000e-01 : f32
    %14 = vector.broadcast %cst_10 : f32 to vector<2x8xf32>
    %15 = arith.mulf %13, %14 : vector<2x8xf32>
    %cst_11 = arith.constant 5.000000e-01 : f32
    %16 = vector.broadcast %cst_11 : f32 to vector<2x8xf32>
    %17 = arith.addf %15, %16 : vector<2x8xf32>
    %18 = vector.extract_strided_slice %12 {offsets = [0, 8], sizes = [2, 8], strides = [1, 1]} : vector<2x32xf32> to vector<2x8xf32>
    %cst_12 = arith.constant 5.000000e-01 : f32
    %19 = vector.broadcast %cst_12 : f32 to vector<2x8xf32>
    %20 = arith.mulf %18, %19 : vector<2x8xf32>
    %cst_13 = arith.constant 5.000000e-01 : f32
    %21 = vector.broadcast %cst_13 : f32 to vector<2x8xf32>
    %22 = arith.addf %20, %21 : vector<2x8xf32>
    %23 = vector.extract_strided_slice %12 {offsets = [0, 16], sizes = [2, 8], strides = [1, 1]} : vector<2x32xf32> to vector<2x8xf32>
    %24 = vector.extract_strided_slice %12 {offsets = [0, 24], sizes = [2, 8], strides = [1, 1]} : vector<2x32xf32> to vector<2x8xf32>
    %cst_14 = arith.constant 5.000000e-01 : f32
    %25 = vector.broadcast %cst_14 : f32 to vector<2x8xf32>
    %26 = arith.mulf %24, %25 : vector<2x8xf32>
    %cst_15 = arith.constant 5.000000e-01 : f32
    %27 = vector.broadcast %cst_15 : f32 to vector<2x8xf32>
    %28 = arith.addf %26, %27 : vector<2x8xf32>
    %29 = arith.mulf %22, %8 : vector<2x8xf32>
    %30 = arith.mulf %17, %23 : vector<2x8xf32>
    %31 = arith.addf %29, %30 : vector<2x8xf32>
    %32 = math.tanh %31 : vector<2x8xf32>
    %33 = arith.mulf %28, %32 : vector<2x8xf32>
    %34 = vector.extract_strided_slice %33 {offsets = [0, 0], sizes = [2, 4], strides = [1, 1]} : vector<2x8xf32> to vector<2x4xf32>
    %c0_16 = arith.constant 0 : index
    %c0_17 = arith.constant 0 : index
    %35 = vector.load %arg7[%c0_16, %c0_17] : memref<16x8xf32, #tpu.memory_space<vmem>>, vector<2x4xf32>
    tpu.vector_store %arg7[%c0_16, %c0_17], %34 {strides = array<i32>} : memref<16x8xf32, #tpu.memory_space<vmem>>, vector<2x4xf32>,
    %36 = vector.extract_strided_slice %33 {offsets = [0, 4], sizes = [2, 4], strides = [1, 1]} : vector<2x8xf32> to vector<2x4xf32>
    %c14 = arith.constant 14 : index
    %c4 = arith.constant 4 : index
    %37 = vector.load %arg7[%c14, %c4] : memref<16x8xf32, #tpu.memory_space<vmem>>, vector<2x4xf32>
    tpu.vector_store %arg7[%c14, %c4], %36 {strides = array<i32>} : memref<16x8xf32, #tpu.memory_space<vmem>>, vector<2x4xf32>,
    %38 = vector.extract_strided_slice %5 {offsets = [2, 0], sizes = [2, 32], strides = [1, 1]} : vector<16x32xf32> to vector<2x32xf32>
    %cst_18 = arith.constant dense<0.000000e+00> : vector<2x32xf32>
    %39 = tpu.matmul %33, %6, %cst_18 {dimension_numbers = #tpu.dot_dimension_numbers<[1], [0], [0], [1], [0, 0, 1, 1], [], []>} : vector<2x8xf32>, vector<8x32xf32>, vector<2x32xf32> -> vector<2x32xf32>
    %40 = arith.addf %38, %39 : vector<2x32xf32>
    %41 = math.tanh %40 : vector<2x32xf32>
    %42 = vector.extract_strided_slice %41 {offsets = [0, 0], sizes = [2, 8], strides = [1, 1]} : vector<2x32xf32> to vector<2x8xf32>
    %cst_19 = arith.constant 5.000000e-01 : f32
    %43 = vector.broadcast %cst_19 : f32 to vector<2x8xf32>
    %44 = arith.mulf %42, %43 : vector<2x8xf32>
    %cst_20 = arith.constant 5.000000e-01 : f32
    %45 = vector.broadcast %cst_20 : f32 to vector<2x8xf32>
    %46 = arith.addf %44, %45 : vector<2x8xf32>
    %47 = vector.extract_strided_slice %41 {offsets = [0, 8], sizes = [2, 8], strides = [1, 1]} : vector<2x32xf32> to vector<2x8xf32>
    %cst_21 = arith.constant 5.000000e-01 : f32
    %48 = vector.broadcast %cst_21 : f32 to vector<2x8xf32>
    %49 = arith.mulf %47, %48 : vector<2x8xf32>
    %cst_22 = arith.constant 5.000000e-01 : f32
    %50 = vector.broadcast %cst_22 : f32 to vector<2x8xf32>
    %51 = arith.addf %49, %50 : vector<2x8xf32>
    %52 = vector.extract_strided_slice %41 {offsets = [0, 16], sizes = [2, 8], strides = [1, 1]} : vector<2x32xf32> to vector<2x8xf32>
    %53 = vector.extract_strided_slice %41 {offsets = [0, 24], sizes = [2, 8], strides = [1, 1]} : vector<2x32xf32> to vector<2x8xf32>
    %cst_23 = arith.constant 5.000000e-01 : f32
    %54 = vector.broadcast %cst_23 : f32 to vector<2x8xf32>
    %55 = arith.mulf %53, %54 : vector<2x8xf32>
    %cst_24 = arith.constant 5.000000e-01 : f32
    %56 = vector.broadcast %cst_24 : f32 to vector<2x8xf32>
    %57 = arith.addf %55, %56 : vector<2x8xf32>
    %58 = arith.mulf %51, %31 : vector<2x8xf32>
    %59 = arith.mulf %46, %52 : vector<2x8xf32>
    %60 = arith.addf %58, %59 : vector<2x8xf32>
    %61 = math.tanh %60 : vector<2x8xf32>
    %62 = arith.mulf %57, %61 : vector<2x8xf32>
    %63 = vector.extract_strided_slice %62 {offsets = [0, 0], sizes = [2, 4], strides = [1, 1]} : vector<2x8xf32> to vector<2x4xf32>
    %c2 = arith.constant 2 : index
    %c0_25 = arith.constant 0 : index
    %64 = vector.load %arg7[%c2, %c0_25] : memref<16x8xf32, #tpu.memory_space<vmem>>, vector<2x4xf32>
    tpu.vector_store %arg7[%c2, %c0_25], %63 {strides = array<i32>} : memref<16x8xf32, #tpu.memory_space<vmem>>, vector<2x4xf32>,
    %65 = vector.extract_strided_slice %62 {offsets = [0, 4], sizes = [2, 4], strides = [1, 1]} : vector<2x8xf32> to vector<2x4xf32>
    %c12 = arith.constant 12 : index
    %c4_26 = arith.constant 4 : index
    %66 = vector.load %arg7[%c12, %c4_26] : memref<16x8xf32, #tpu.memory_space<vmem>>, vector<2x4xf32>
    tpu.vector_store %arg7[%c12, %c4_26], %65 {strides = array<i32>} : memref<16x8xf32, #tpu.memory_space<vmem>>, vector<2x4xf32>,
    %67 = vector.extract_strided_slice %5 {offsets = [4, 0], sizes = [2, 32], strides = [1, 1]} : vector<16x32xf32> to vector<2x32xf32>
    %cst_27 = arith.constant dense<0.000000e+00> : vector<2x32xf32>
    %68 = tpu.matmul %62, %6, %cst_27 {dimension_numbers = #tpu.dot_dimension_numbers<[1], [0], [0], [1], [0, 0, 1, 1], [], []>} : vector<2x8xf32>, vector<8x32xf32>, vector<2x32xf32> -> vector<2x32xf32>
    %69 = arith.addf %67, %68 : vector<2x32xf32>
    %70 = math.tanh %69 : vector<2x32xf32>
    %71 = vector.extract_strided_slice %70 {offsets = [0, 0], sizes = [2, 8], strides = [1, 1]} : vector<2x32xf32> to vector<2x8xf32>
    %cst_28 = arith.constant 5.000000e-01 : f32
    %72 = vector.broadcast %cst_28 : f32 to vector<2x8xf32>
    %73 = arith.mulf %71, %72 : vector<2x8xf32>
    %cst_29 = arith.constant 5.000000e-01 : f32
    %74 = vector.broadcast %cst_29 : f32 to vector<2x8xf32>
    %75 = arith.addf %73, %74 : vector<2x8xf32>
    %76 = vector.extract_strided_slice %70 {offsets = [0, 8], sizes = [2, 8], strides = [1, 1]} : vector<2x32xf32> to vector<2x8xf32>
    %cst_30 = arith.constant 5.000000e-01 : f32
    %77 = vector.broadcast %cst_30 : f32 to vector<2x8xf32>
    %78 = arith.mulf %76, %77 : vector<2x8xf32>
    %cst_31 = arith.constant 5.000000e-01 : f32
    %79 = vector.broadcast %cst_31 : f32 to vector<2x8xf32>
    %80 = arith.addf %78, %79 : vector<2x8xf32>
    %81 = vector.extract_strided_slice %70 {offsets = [0, 16], sizes = [2, 8], strides = [1, 1]} : vector<2x32xf32> to vector<2x8xf32>
    %82 = vector.extract_strided_slice %70 {offsets = [0, 24], sizes = [2, 8], strides = [1, 1]} : vector<2x32xf32> to vector<2x8xf32>
    %cst_32 = arith.constant 5.000000e-01 : f32
    %83 = vector.broadcast %cst_32 : f32 to vector<2x8xf32>
    %84 = arith.mulf %82, %83 : vector<2x8xf32>
    %cst_33 = arith.constant 5.000000e-01 : f32
    %85 = vector.broadcast %cst_33 : f32 to vector<2x8xf32>
    %86 = arith.addf %84, %85 : vector<2x8xf32>
    %87 = arith.mulf %80, %60 : vector<2x8xf32>
    %88 = arith.mulf %75, %81 : vector<2x8xf32>
    %89 = arith.addf %87, %88 : vector<2x8xf32>
    %90 = math.tanh %89 : vector<2x8xf32>
    %91 = arith.mulf %86, %90 : vector<2x8xf32>
    %92 = vector.extract_strided_slice %91 {offsets = [0, 0], sizes = [2, 4], strides = [1, 1]} : vector<2x8xf32> to vector<2x4xf32>
    %c4_34 = arith.constant 4 : index
    %c0_35 = arith.constant 0 : index
    %93 = vector.load %arg7[%c4_34, %c0_35] : memref<16x8xf32, #tpu.memory_space<vmem>>, vector<2x4xf32>
    tpu.vector_store %arg7[%c4_34, %c0_35], %92 {strides = array<i32>} : memref<16x8xf32, #tpu.memory_space<vmem>>, vector<2x4xf32>,
    %94 = vector.extract_strided_slice %91 {offsets = [0, 4], sizes = [2, 4], strides = [1, 1]} : vector<2x8xf32> to vector<2x4xf32>
    %c10 = arith.constant 10 : index
    %c4_36 = arith.constant 4 : index
    %95 = vector.load %arg7[%c10, %c4_36] : memref<16x8xf32, #tpu.memory_space<vmem>>, vector<2x4xf32>
    tpu.vector_store %arg7[%c10, %c4_36], %94 {strides = array<i32>} : memref<16x8xf32, #tpu.memory_space<vmem>>, vector<2x4xf32>,
    %96 = vector.extract_strided_slice %5 {offsets = [6, 0], sizes = [2, 32], strides = [1, 1]} : vector<16x32xf32> to vector<2x32xf32>
    %cst_37 = arith.constant dense<0.000000e+00> : vector<2x32xf32>
    %97 = tpu.matmul %91, %6, %cst_37 {dimension_numbers = #tpu.dot_dimension_numbers<[1], [0], [0], [1], [0, 0, 1, 1], [], []>} : vector<2x8xf32>, vector<8x32xf32>, vector<2x32xf32> -> vector<2x32xf32>
    %98 = arith.addf %96, %97 : vector<2x32xf32>
    %99 = math.tanh %98 : vector<2x32xf32>
    %100 = vector.extract_strided_slice %99 {offsets = [0, 0], sizes = [2, 8], strides = [1, 1]} : vector<2x32xf32> to vector<2x8xf32>
    %cst_38 = arith.constant 5.000000e-01 : f32
    %101 = vector.broadcast %cst_38 : f32 to vector<2x8xf32>
    %102 = arith.mulf %100, %101 : vector<2x8xf32>
    %cst_39 = arith.constant 5.000000e-01 : f32
    %103 = vector.broadcast %cst_39 : f32 to vector<2x8xf32>
    %104 = arith.addf %102, %103 : vector<2x8xf32>
    %105 = vector.extract_strided_slice %99 {offsets = [0, 8], sizes = [2, 8], strides = [1, 1]} : vector<2x32xf32> to vector<2x8xf32>
    %cst_40 = arith.constant 5.000000e-01 : f32
    %106 = vector.broadcast %cst_40 : f32 to vector<2x8xf32>
    %107 = arith.mulf %105, %106 : vector<2x8xf32>
    %cst_41 = arith.constant 5.000000e-01 : f32
    %108 = vector.broadcast %cst_41 : f32 to vector<2x8xf32>
    %109 = arith.addf %107, %108 : vector<2x8xf32>
    %110 = vector.extract_strided_slice %99 {offsets = [0, 16], sizes = [2, 8], strides = [1, 1]} : vector<2x32xf32> to vector<2x8xf32>
    %111 = vector.extract_strided_slice %99 {offsets = [0, 24], sizes = [2, 8], strides = [1, 1]} : vector<2x32xf32> to vector<2x8xf32>
    %cst_42 = arith.constant 5.000000e-01 : f32
    %112 = vector.broadcast %cst_42 : f32 to vector<2x8xf32>
    %113 = arith.mulf %111, %112 : vector<2x8xf32>
    %cst_43 = arith.constant 5.000000e-01 : f32
    %114 = vector.broadcast %cst_43 : f32 to vector<2x8xf32>
    %115 = arith.addf %113, %114 : vector<2x8xf32>
    %116 = arith.mulf %109, %89 : vector<2x8xf32>
    %117 = arith.mulf %104, %110 : vector<2x8xf32>
    %118 = arith.addf %116, %117 : vector<2x8xf32>
    %119 = math.tanh %118 : vector<2x8xf32>
    %120 = arith.mulf %115, %119 : vector<2x8xf32>
    %121 = vector.extract_strided_slice %120 {offsets = [0, 0], sizes = [2, 4], strides = [1, 1]} : vector<2x8xf32> to vector<2x4xf32>
    %c6 = arith.constant 6 : index
    %c0_44 = arith.constant 0 : index
    %122 = vector.load %arg7[%c6, %c0_44] : memref<16x8xf32, #tpu.memory_space<vmem>>, vector<2x4xf32>
    tpu.vector_store %arg7[%c6, %c0_44], %121 {strides = array<i32>} : memref<16x8xf32, #tpu.memory_space<vmem>>, vector<2x4xf32>,
    %123 = vector.extract_strided_slice %120 {offsets = [0, 4], sizes = [2, 4], strides = [1, 1]} : vector<2x8xf32> to vector<2x4xf32>
    %c8 = arith.constant 8 : index
    %c4_45 = arith.constant 4 : index
    %124 = vector.load %arg7[%c8, %c4_45] : memref<16x8xf32, #tpu.memory_space<vmem>>, vector<2x4xf32>
    tpu.vector_store %arg7[%c8, %c4_45], %123 {strides = array<i32>} : memref<16x8xf32, #tpu.memory_space<vmem>>, vector<2x4xf32>,
    %125 = vector.extract_strided_slice %5 {offsets = [8, 0], sizes = [2, 32], strides = [1, 1]} : vector<16x32xf32> to vector<2x32xf32>
    %cst_46 = arith.constant dense<0.000000e+00> : vector<2x32xf32>
    %126 = tpu.matmul %120, %6, %cst_46 {dimension_numbers = #tpu.dot_dimension_numbers<[1], [0], [0], [1], [0, 0, 1, 1], [], []>} : vector<2x8xf32>, vector<8x32xf32>, vector<2x32xf32> -> vector<2x32xf32>
    %127 = arith.addf %125, %126 : vector<2x32xf32>
    %128 = math.tanh %127 : vector<2x32xf32>
    %129 = vector.extract_strided_slice %128 {offsets = [0, 0], sizes = [2, 8], strides = [1, 1]} : vector<2x32xf32> to vector<2x8xf32>
    %cst_47 = arith.constant 5.000000e-01 : f32
    %130 = vector.broadcast %cst_47 : f32 to vector<2x8xf32>
    %131 = arith.mulf %129, %130 : vector<2x8xf32>
    %cst_48 = arith.constant 5.000000e-01 : f32
    %132 = vector.broadcast %cst_48 : f32 to vector<2x8xf32>
    %133 = arith.addf %131, %132 : vector<2x8xf32>
    %134 = vector.extract_strided_slice %128 {offsets = [0, 8], sizes = [2, 8], strides = [1, 1]} : vector<2x32xf32> to vector<2x8xf32>
    %cst_49 = arith.constant 5.000000e-01 : f32
    %135 = vector.broadcast %cst_49 : f32 to vector<2x8xf32>
    %136 = arith.mulf %134, %135 : vector<2x8xf32>
    %cst_50 = arith.constant 5.000000e-01 : f32
    %137 = vector.broadcast %cst_50 : f32 to vector<2x8xf32>
    %138 = arith.addf %136, %137 : vector<2x8xf32>
    %139 = vector.extract_strided_slice %128 {offsets = [0, 16], sizes = [2, 8], strides = [1, 1]} : vector<2x32xf32> to vector<2x8xf32>
    %140 = vector.extract_strided_slice %128 {offsets = [0, 24], sizes = [2, 8], strides = [1, 1]} : vector<2x32xf32> to vector<2x8xf32>
    %cst_51 = arith.constant 5.000000e-01 : f32
    %141 = vector.broadcast %cst_51 : f32 to vector<2x8xf32>
    %142 = arith.mulf %140, %141 : vector<2x8xf32>
    %cst_52 = arith.constant 5.000000e-01 : f32
    %143 = vector.broadcast %cst_52 : f32 to vector<2x8xf32>
    %144 = arith.addf %142, %143 : vector<2x8xf32>
    %145 = arith.mulf %138, %118 : vector<2x8xf32>
    %146 = arith.mulf %133, %139 : vector<2x8xf32>
    %147 = arith.addf %145, %146 : vector<2x8xf32>
    %148 = math.tanh %147 : vector<2x8xf32>
    %149 = arith.mulf %144, %148 : vector<2x8xf32>
    %150 = vector.extract_strided_slice %149 {offsets = [0, 0], sizes = [2, 4], strides = [1, 1]} : vector<2x8xf32> to vector<2x4xf32>
    %c8_53 = arith.constant 8 : index
    %c0_54 = arith.constant 0 : index
    %151 = vector.load %arg7[%c8_53, %c0_54] : memref<16x8xf32, #tpu.memory_space<vmem>>, vector<2x4xf32>
    tpu.vector_store %arg7[%c8_53, %c0_54], %150 {strides = array<i32>} : memref<16x8xf32, #tpu.memory_space<vmem>>, vector<2x4xf32>,
    %152 = vector.extract_strided_slice %149 {offsets = [0, 4], sizes = [2, 4], strides = [1, 1]} : vector<2x8xf32> to vector<2x4xf32>
    %c6_55 = arith.constant 6 : index
    %c4_56 = arith.constant 4 : index
    %153 = vector.load %arg7[%c6_55, %c4_56] : memref<16x8xf32, #tpu.memory_space<vmem>>, vector<2x4xf32>
    tpu.vector_store %arg7[%c6_55, %c4_56], %152 {strides = array<i32>} : memref<16x8xf32, #tpu.memory_space<vmem>>, vector<2x4xf32>,
    %154 = vector.extract_strided_slice %5 {offsets = [10, 0], sizes = [2, 32], strides = [1, 1]} : vector<16x32xf32> to vector<2x32xf32>
    %cst_57 = arith.constant dense<0.000000e+00> : vector<2x32xf32>
    %155 = tpu.matmul %149, %6, %cst_57 {dimension_numbers = #tpu.dot_dimension_numbers<[1], [0], [0], [1], [0, 0, 1, 1], [], []>} : vector<2x8xf32>, vector<8x32xf32>, vector<2x32xf32> -> vector<2x32xf32>
    %156 = arith.addf %154, %155 : vector<2x32xf32>
    %157 = math.tanh %156 : vector<2x32xf32>
    %158 = vector.extract_strided_slice %157 {offsets = [0, 0], sizes = [2, 8], strides = [1, 1]} : vector<2x32xf32> to vector<2x8xf32>
    %cst_58 = arith.constant 5.000000e-01 : f32
    %159 = vector.broadcast %cst_58 : f32 to vector<2x8xf32>
    %160 = arith.mulf %158, %159 : vector<2x8xf32>
    %cst_59 = arith.constant 5.000000e-01 : f32
    %161 = vector.broadcast %cst_59 : f32 to vector<2x8xf32>
    %162 = arith.addf %160, %161 : vector<2x8xf32>
    %163 = vector.extract_strided_slice %157 {offsets = [0, 8], sizes = [2, 8], strides = [1, 1]} : vector<2x32xf32> to vector<2x8xf32>
    %cst_60 = arith.constant 5.000000e-01 : f32
    %164 = vector.broadcast %cst_60 : f32 to vector<2x8xf32>
    %165 = arith.mulf %163, %164 : vector<2x8xf32>
    %cst_61 = arith.constant 5.000000e-01 : f32
    %166 = vector.broadcast %cst_61 : f32 to vector<2x8xf32>
    %167 = arith.addf %165, %166 : vector<2x8xf32>
    %168 = vector.extract_strided_slice %157 {offsets = [0, 16], sizes = [2, 8], strides = [1, 1]} : vector<2x32xf32> to vector<2x8xf32>
    %169 = vector.extract_strided_slice %157 {offsets = [0, 24], sizes = [2, 8], strides = [1, 1]} : vector<2x32xf32> to vector<2x8xf32>
    %cst_62 = arith.constant 5.000000e-01 : f32
    %170 = vector.broadcast %cst_62 : f32 to vector<2x8xf32>
    %171 = arith.mulf %169, %170 : vector<2x8xf32>
    %cst_63 = arith.constant 5.000000e-01 : f32
    %172 = vector.broadcast %cst_63 : f32 to vector<2x8xf32>
    %173 = arith.addf %171, %172 : vector<2x8xf32>
    %174 = arith.mulf %167, %147 : vector<2x8xf32>
    %175 = arith.mulf %162, %168 : vector<2x8xf32>
    %176 = arith.addf %174, %175 : vector<2x8xf32>
    %177 = math.tanh %176 : vector<2x8xf32>
    %178 = arith.mulf %173, %177 : vector<2x8xf32>
    %179 = vector.extract_strided_slice %178 {offsets = [0, 0], sizes = [2, 4], strides = [1, 1]} : vector<2x8xf32> to vector<2x4xf32>
    %c10_64 = arith.constant 10 : index
    %c0_65 = arith.constant 0 : index
    %180 = vector.load %arg7[%c10_64, %c0_65] : memref<16x8xf32, #tpu.memory_space<vmem>>, vector<2x4xf32>
    tpu.vector_store %arg7[%c10_64, %c0_65], %179 {strides = array<i32>} : memref<16x8xf32, #tpu.memory_space<vmem>>, vector<2x4xf32>,
    %181 = vector.extract_strided_slice %178 {offsets = [0, 4], sizes = [2, 4], strides = [1, 1]} : vector<2x8xf32> to vector<2x4xf32>
    %c4_66 = arith.constant 4 : index
    %c4_67 = arith.constant 4 : index
    %182 = vector.load %arg7[%c4_66, %c4_67] : memref<16x8xf32, #tpu.memory_space<vmem>>, vector<2x4xf32>
    tpu.vector_store %arg7[%c4_66, %c4_67], %181 {strides = array<i32>} : memref<16x8xf32, #tpu.memory_space<vmem>>, vector<2x4xf32>,
    %183 = vector.extract_strided_slice %5 {offsets = [12, 0], sizes = [2, 32], strides = [1, 1]} : vector<16x32xf32> to vector<2x32xf32>
    %cst_68 = arith.constant dense<0.000000e+00> : vector<2x32xf32>
    %184 = tpu.matmul %178, %6, %cst_68 {dimension_numbers = #tpu.dot_dimension_numbers<[1], [0], [0], [1], [0, 0, 1, 1], [], []>} : vector<2x8xf32>, vector<8x32xf32>, vector<2x32xf32> -> vector<2x32xf32>
    %185 = arith.addf %183, %184 : vector<2x32xf32>
    %186 = math.tanh %185 : vector<2x32xf32>
    %187 = vector.extract_strided_slice %186 {offsets = [0, 0], sizes = [2, 8], strides = [1, 1]} : vector<2x32xf32> to vector<2x8xf32>
    %cst_69 = arith.constant 5.000000e-01 : f32
    %188 = vector.broadcast %cst_69 : f32 to vector<2x8xf32>
    %189 = arith.mulf %187, %188 : vector<2x8xf32>
    %cst_70 = arith.constant 5.000000e-01 : f32
    %190 = vector.broadcast %cst_70 : f32 to vector<2x8xf32>
    %191 = arith.addf %189, %190 : vector<2x8xf32>
    %192 = vector.extract_strided_slice %186 {offsets = [0, 8], sizes = [2, 8], strides = [1, 1]} : vector<2x32xf32> to vector<2x8xf32>
    %cst_71 = arith.constant 5.000000e-01 : f32
    %193 = vector.broadcast %cst_71 : f32 to vector<2x8xf32>
    %194 = arith.mulf %192, %193 : vector<2x8xf32>
    %cst_72 = arith.constant 5.000000e-01 : f32
    %195 = vector.broadcast %cst_72 : f32 to vector<2x8xf32>
    %196 = arith.addf %194, %195 : vector<2x8xf32>
    %197 = vector.extract_strided_slice %186 {offsets = [0, 16], sizes = [2, 8], strides = [1, 1]} : vector<2x32xf32> to vector<2x8xf32>
    %198 = vector.extract_strided_slice %186 {offsets = [0, 24], sizes = [2, 8], strides = [1, 1]} : vector<2x32xf32> to vector<2x8xf32>
    %cst_73 = arith.constant 5.000000e-01 : f32
    %199 = vector.broadcast %cst_73 : f32 to vector<2x8xf32>
    %200 = arith.mulf %198, %199 : vector<2x8xf32>
    %cst_74 = arith.constant 5.000000e-01 : f32
    %201 = vector.broadcast %cst_74 : f32 to vector<2x8xf32>
    %202 = arith.addf %200, %201 : vector<2x8xf32>
    %203 = arith.mulf %196, %176 : vector<2x8xf32>
    %204 = arith.mulf %191, %197 : vector<2x8xf32>
    %205 = arith.addf %203, %204 : vector<2x8xf32>
    %206 = math.tanh %205 : vector<2x8xf32>
    %207 = arith.mulf %202, %206 : vector<2x8xf32>
    %208 = vector.extract_strided_slice %207 {offsets = [0, 0], sizes = [2, 4], strides = [1, 1]} : vector<2x8xf32> to vector<2x4xf32>
    %c12_75 = arith.constant 12 : index
    %c0_76 = arith.constant 0 : index
    %209 = vector.load %arg7[%c12_75, %c0_76] : memref<16x8xf32, #tpu.memory_space<vmem>>, vector<2x4xf32>
    tpu.vector_store %arg7[%c12_75, %c0_76], %208 {strides = array<i32>} : memref<16x8xf32, #tpu.memory_space<vmem>>, vector<2x4xf32>,
    %210 = vector.extract_strided_slice %207 {offsets = [0, 4], sizes = [2, 4], strides = [1, 1]} : vector<2x8xf32> to vector<2x4xf32>
    %c2_77 = arith.constant 2 : index
    %c4_78 = arith.constant 4 : index
    %211 = vector.load %arg7[%c2_77, %c4_78] : memref<16x8xf32, #tpu.memory_space<vmem>>, vector<2x4xf32>
    tpu.vector_store %arg7[%c2_77, %c4_78], %210 {strides = array<i32>} : memref<16x8xf32, #tpu.memory_space<vmem>>, vector<2x4xf32>,
    %212 = vector.extract_strided_slice %5 {offsets = [14, 0], sizes = [2, 32], strides = [1, 1]} : vector<16x32xf32> to vector<2x32xf32>
    %cst_79 = arith.constant dense<0.000000e+00> : vector<2x32xf32>
    %213 = tpu.matmul %207, %6, %cst_79 {dimension_numbers = #tpu.dot_dimension_numbers<[1], [0], [0], [1], [0, 0, 1, 1], [], []>} : vector<2x8xf32>, vector<8x32xf32>, vector<2x32xf32> -> vector<2x32xf32>
    %214 = arith.addf %212, %213 : vector<2x32xf32>
    %215 = math.tanh %214 : vector<2x32xf32>
    %216 = vector.extract_strided_slice %215 {offsets = [0, 0], sizes = [2, 8], strides = [1, 1]} : vector<2x32xf32> to vector<2x8xf32>
    %cst_80 = arith.constant 5.000000e-01 : f32
    %217 = vector.broadcast %cst_80 : f32 to vector<2x8xf32>
    %218 = arith.mulf %216, %217 : vector<2x8xf32>
    %cst_81 = arith.constant 5.000000e-01 : f32
    %219 = vector.broadcast %cst_81 : f32 to vector<2x8xf32>
    %220 = arith.addf %218, %219 : vector<2x8xf32>
    %221 = vector.extract_strided_slice %215 {offsets = [0, 8], sizes = [2, 8], strides = [1, 1]} : vector<2x32xf32> to vector<2x8xf32>
    %cst_82 = arith.constant 5.000000e-01 : f32
    %222 = vector.broadcast %cst_82 : f32 to vector<2x8xf32>
    %223 = arith.mulf %221, %222 : vector<2x8xf32>
    %cst_83 = arith.constant 5.000000e-01 : f32
    %224 = vector.broadcast %cst_83 : f32 to vector<2x8xf32>
    %225 = arith.addf %223, %224 : vector<2x8xf32>
    %226 = vector.extract_strided_slice %215 {offsets = [0, 16], sizes = [2, 8], strides = [1, 1]} : vector<2x32xf32> to vector<2x8xf32>
    %227 = vector.extract_strided_slice %215 {offsets = [0, 24], sizes = [2, 8], strides = [1, 1]} : vector<2x32xf32> to vector<2x8xf32>
    %cst_84 = arith.constant 5.000000e-01 : f32
    %228 = vector.broadcast %cst_84 : f32 to vector<2x8xf32>
    %229 = arith.mulf %227, %228 : vector<2x8xf32>
    %cst_85 = arith.constant 5.000000e-01 : f32
    %230 = vector.broadcast %cst_85 : f32 to vector<2x8xf32>
    %231 = arith.addf %229, %230 : vector<2x8xf32>
    %232 = arith.mulf %225, %205 : vector<2x8xf32>
    %233 = arith.mulf %220, %226 : vector<2x8xf32>
    %234 = arith.addf %232, %233 : vector<2x8xf32>
    %235 = math.tanh %234 : vector<2x8xf32>
    %236 = arith.mulf %231, %235 : vector<2x8xf32>
    %237 = vector.extract_strided_slice %236 {offsets = [0, 0], sizes = [2, 4], strides = [1, 1]} : vector<2x8xf32> to vector<2x4xf32>
    %c14_86 = arith.constant 14 : index
    %c0_87 = arith.constant 0 : index
    %238 = vector.load %arg7[%c14_86, %c0_87] : memref<16x8xf32, #tpu.memory_space<vmem>>, vector<2x4xf32>
    tpu.vector_store %arg7[%c14_86, %c0_87], %237 {strides = array<i32>} : memref<16x8xf32, #tpu.memory_space<vmem>>, vector<2x4xf32>,
    %239 = vector.extract_strided_slice %236 {offsets = [0, 4], sizes = [2, 4], strides = [1, 1]} : vector<2x8xf32> to vector<2x4xf32>
    %c0_88 = arith.constant 0 : index
    %c4_89 = arith.constant 4 : index
    %240 = vector.load %arg7[%c0_88, %c4_89] : memref<16x8xf32, #tpu.memory_space<vmem>>, vector<2x4xf32>
    tpu.vector_store %arg7[%c0_88, %c4_89], %239 {strides = array<i32>} : memref<16x8xf32, #tpu.memory_space<vmem>>, vector<2x4xf32>,
    %c0_90 = arith.constant 0 : index
    %c0_91 = arith.constant 0 : index
    %241 = vector.load %arg7[%c0_90, %c0_91] : memref<16x8xf32, #tpu.memory_space<vmem>>, vector<16x8xf32>
    %c0_92 = arith.constant 0 : index
    %c0_93 = arith.constant 0 : index
    %242 = vector.load %arg4[%c0_92, %c0_93] : memref<8x1xf32, #tpu.memory_space<vmem>>, vector<8x1xf32>
    %cst_94 = arith.constant dense<0.000000e+00> : vector<16x1xf32>
    %243 = tpu.matmul %241, %242, %cst_94 {dimension_numbers = #tpu.dot_dimension_numbers<[1], [0], [0], [1], [0, 0, 1, 1], [], []>} : vector<16x8xf32>, vector<8x1xf32>, vector<16x1xf32> -> vector<16x1xf32>
    %c0_95 = arith.constant 0 : index
    %c0_96 = arith.constant 0 : index
    %244 = vector.load %arg5[%c0_95, %c0_96] : memref<1x1xf32, #tpu.memory_space<vmem>>, vector<1x1xf32>
    %245 = vector.broadcast %244 : vector<1x1xf32> to vector<16x1xf32>
    %246 = arith.addf %243, %245 : vector<16x1xf32>
    %c0_97 = arith.constant 0 : index
    %c0_98 = arith.constant 0 : index
    %247 = vector.load %arg6[%c0_97, %c0_98] : memref<16x1xf32, #tpu.memory_space<vmem>>, vector<16x1xf32>
    tpu.vector_store %arg6[%c0_97, %c0_98], %246 {strides = array<i32>} : memref<16x1xf32, #tpu.memory_space<vmem>>, vector<16x1xf32>,
    return
  }
}

</mosaic_0001>

<bundles_post_ra>
// kernel: lstm_neureka_forward.1
= control target key start
LH: loop header
LB: loop body
LE: loop exit
PB: predicated region body
PF: predicated region fallthrough
CT: control target
= control target key end

     0   :  { %vm39_vm0 = vcmask 1043456   ;;  %vm32_vm1 = vcmask 31744   ;;  %v617_v3 = vmov 0.0   ;;  %s619_s28 = smov 8   ;;  %s621_s29 = smov 104   ;;  %vm116_vm2 = vcmask 25600   ;;  %s773_s1 = inlined_call_operand.vmem [shape: f32[4,32], index: 1, kind: input, shape index: {}]   ;;  %s774_s0 = inlined_call_operand.vmem [shape: f32[16,4], index: 0, kind: input, shape index: {}]   ;;  %s775_s2 = inlined_call_operand.vmem [shape: f32[8,32], index: 2, kind: input, shape index: {}]   ;;  %s776_s3 = inlined_call_operand.vmem [shape: f32[1,32], index: 3, kind: input, shape index: {}]   ;;  %s777_s4 = inlined_call_operand.vmem [shape: f32[8,1], index: 4, kind: input, shape index: {}]   ;;  %s778_s5 = inlined_call_operand.<no memory space> [shape: f32[1,1], index: 5, kind: input, shape index: {}]   ;;  %s779_s6 = inlined_call_operand.vmem [shape: f32[16,1], index: 6, kind: output, shape index: {}]  }
   0x1   :  { %v27_v0 = vld [vmem:[%s773_s1] sm:$0xf]  ;;  %vm67_vm3 = vcmask 64512   ;;  %vm118_vm4 = vcmask 58400   ;;  %vm173_vm5 = vcmask 27650   ;;  %vm175_vm6 = vcmask 60450  }
   0x2   :  { %v25_v1 = vld [vmem:[%s774_s0] sm:$0xff]  ;;  %566 = vmatpush.msk.msra.mxu0 %vm39_vm0, %v27_v0  ;;  %vm233_vm7 = vcmask 29700   ;;  %vm235_vm8 = vcmask 62500   ;;  %vm293_vm9 = vcmask 31750   ;;  %vm295_vm10 = vcmask 64550  }
   0x3   :  { %v66_v2 = vld [vmem:[%s775_s2] sm:$0xff]  ;;  %567 = vmatmul.msk.f32.vlgmr.msra.gmra.mxu0 %vm32_vm1, %v25_v1  ;;  %s618_s2 = smov 112   ;;  %vm559_vm11 = vcmask 7168  }
   0x4   :  { %86 = vmatpush.msra.mxu1 %v66_v2  ;;  %137 = vmatpush.msra.mxu3 %v66_v2  ;;  %v670_v4 = vld [vmem:[%s776_s3] ss:$0 sm:$0xff]  ;;  %s620_s3 = smov 16  }
   0x5   :  { %87 = vmatmul.f32.vlgmr.msra.gmra.mxu1 %v617_v3  ;;  %317 = vmatpush.msra.mxu2 %v66_v2 }
   0x6   :  { %257 = vmatpush.msrb.mxu1 %v66_v2  ;;  %197 = vmatpush.msrb.mxu3 %v66_v2 }
   0x7   :  { %427 = vmatpush.msrb.mxu0 %v66_v2 }
   0x8   :  { %485 = vmatpush.msra.mxu1 %v66_v2 }
  0x80   :  { %v60_v5 = vpop.f32.mrf.mxu0 }
  0x81   :  { %v673_v7 = vadd.f32 %v670_v4, %v60_v5 }
  0x82   :  { %v88_v6 = vpop.f32.mrf.mxu1 }
  0x83   :  { %v91_v8 = vadd.f32 %v88_v6, %v673_v7 }
  0x85   :  { %585 = vtanh.f32 %v91_v8  ;;  %v26_v8 = vld [vmem:[%s774_s0 + $0x8] sm:$0xff] }
  0x86   :  { %568 = vmatmul.msk.f32.gmra.mxu0 %vm32_vm1, %v26_v8 }
  0x8b   :  { %v586_v9 = vpop.eup %585 }
  0x8c   :  { %97 = vrot.lane.b32.xlu0 %v586_v9, %s618_s2  ;;  %v93_v10 = vmul.f32 0.5, %v586_v9 }
  0x8e   :  { %v94_v11 = vadd.f32 0.5, %v93_v10 }
  0x90   :  { %v95_v14 = vmul.f32 0.0, %v94_v11 }
  0xfe   :  { %v98_v12 = vpop.permute.xlu0 %97 }
  0xff   :  { %v100_v13 = vmul.f32 %v98_v12, %v94_v11 }
 0x101   :  { %102 = vrot.lane.b32.xlu0 %v100_v13, %s619_s28 }
 0x103   :  { %v63_v10 = vpop.f32.mrf.mxu0 }
 0x173   :  { %v103_v15 = vpop.permute.xlu0 %102 }
 0x174   :  { %v105_v16 = vadd.f32 %v103_v15, %v95_v14 }
 0x176   :  { %587 = vtanh.f32 %v105_v16  ;;  %v150_v29 = vrot.slane %v105_v16, 6 }
 0x17c   :  { %v588_v17 = vpop.eup %587 }
 0x17d   :  { %108 = vrot.lane.b32.xlu1 %v588_v17, %s620_s3 }
 0x1ef   :  { %v109_v18 = vpop.permute.xlu1 %108 }
 0x1f0   :  { %v111_v19 = vmul.f32 %v109_v18, %v94_v11  ;;  %v715_v11 = vadd.f32 %v670_v4, %v63_v10 }
 0x1f2   :  { %113 = vrot.lane.b32.xlu1 %v111_v19, %s621_s29 }
 0x264   :  { %v114_v20 = vpop.permute.xlu1 %113 }
 0x265   :  { %117 = vst.msk [vmem:[#allocation2] sm:$0x3] %vm116_vm2, %v114_v20  ;;  %569 = vmatmul.msk.f32.vlgmr.msra.gmra.mxu3 %vm67_vm3, %v114_v20 }
 0x266   :  { %119 = vst.msk [vmem:[#allocation2 + $0xe] sm:$0x3] %vm118_vm4, %v114_v20  ;;  %369 = vmatpush.msra.mxu3 %v66_v2 }
 0x2e8   :  { %v139_v21 = vpop.f32.mrf.mxu3 }
 0x2e9   :  { %v143_v22 = vrot.slane %v139_v21, 6 }
 0x2eb   :  { %v145_v23 = vadd.f32 %v143_v22, %v673_v7 }
 0x2ed   :  { %589 = vtanh.f32 %v145_v23 }
 0x2f3   :  { %v590_v24 = vpop.eup %589 }
 0x2f4   :  { %154 = vrot.lane.b32.xlu2 %v590_v24, %s618_s2  ;;  %v147_v25 = vmul.f32 0.5, %v590_v24 }
 0x2f6   :  { %v148_v26 = vadd.f32 0.5, %v147_v25 }
 0x2f8   :  { %v152_v30 = vmul.f32 %v150_v29, %v148_v26 }
 0x34e   :  { %v155_v27 = vpop.permute.xlu2 %154 }
 0x34f   :  { %v157_v28 = vmul.f32 %v155_v27, %v148_v26 }
 0x351   :  { %159 = vrot.lane.b32.xlu2 %v157_v28, %s619_s28 }
 0x3ab   :  { %v160_v31 = vpop.permute.xlu2 %159 }
 0x3ac   :  { %v162_v32 = vadd.f32 %v160_v31, %v152_v30 }
 0x3ae   :  { %591 = vtanh.f32 %v162_v32  ;;  %v210_v46 = vrot.slane %v162_v32, 6 }
 0x3b4   :  { %v592_v33 = vpop.eup %591 }
 0x3b5   :  { %165 = vrot.lane.b32.xlu0 %v592_v33, %s620_s3 }
 0x427   :  { %v166_v34 = vpop.permute.xlu0 %165 }
 0x428   :  { %v687_v35 = vmul.f32 %v166_v34, %v148_v26 }
 0x42a   :  { %v177_v36 = vrot.slane %v687_v35, 2 }
 0x42c   :  { %178 = vrot.lane.b32.xlu1 %v177_v36, %s621_s29 }
 0x49e   :  { %v179_v37 = vpop.permute.xlu1 %178 }
 0x49f   :  { %570 = vmatmul.msk.f32.vlgmr.msrb.gmra.mxu3 %vm67_vm3, %v179_v37 }
 0x522   :  { %v199_v38 = vpop.f32.mrf.mxu3 }
 0x523   :  { %v203_v39 = vrot.slane %v199_v38, 4 }
 0x525   :  { %v205_v40 = vadd.f32 %v203_v39, %v673_v7 }
 0x527   :  { %593 = vtanh.f32 %v205_v40 }
 0x52d   :  { %v594_v41 = vpop.eup %593 }
 0x52e   :  { %214 = vrot.lane.b32.xlu2 %v594_v41, %s618_s2  ;;  %v207_v42 = vmul.f32 0.5, %v594_v41 }
 0x530   :  { %v208_v43 = vadd.f32 0.5, %v207_v42 }
 0x532   :  { %v212_v47 = vmul.f32 %v210_v46, %v208_v43 }
 0x588   :  { %v215_v44 = vpop.permute.xlu2 %214 }
 0x589   :  { %v217_v45 = vmul.f32 %v215_v44, %v208_v43 }
 0x58b   :  { %219 = vrot.lane.b32.xlu0 %v217_v45, %s619_s28 }
 0x5fd   :  { %v220_v48 = vpop.permute.xlu0 %219 }
 0x5fe   :  { %v222_v49 = vadd.f32 %v220_v48, %v212_v47 }
 0x600   :  { %595 = vtanh.f32 %v222_v49  ;;  %v270_v63 = vrot.slane %v222_v49, 6 }
 0x606   :  { %v596_v50 = vpop.eup %595 }
 0x607   :  { %225 = vrot.lane.b32.xlu1 %v596_v50, %s620_s3 }
 0x679   :  { %v226_v51 = vpop.permute.xlu1 %225 }
 0x67a   :  { %v696_v52 = vmul.f32 %v226_v51, %v208_v43 }
 0x67c   :  { %v237_v53 = vrot.slane %v696_v52, 4 }
 0x67e   :  { %238 = vrot.lane.b32.xlu2 %v237_v53, %s621_s29 }
 0x6d8   :  { %v239_v54 = vpop.permute.xlu2 %238 }
 0x6d9   :  { %571 = vmatmul.msk.f32.vlgmr.msrb.gmra.mxu1 %vm67_vm3, %v239_v54 }
 0x756   :  { %v259_v55 = vpop.f32.mrf.mxu1 }
 0x757   :  { %v263_v56 = vrot.slane %v259_v55, 2 }
 0x759   :  { %v265_v57 = vadd.f32 %v263_v56, %v673_v7 }
 0x75b   :  { %597 = vtanh.f32 %v265_v57 }
 0x761   :  { %v598_v58 = vpop.eup %597 }
 0x762   :  { %274 = vrot.lane.b32.xlu0 %v598_v58, %s618_s2  ;;  %v267_v59 = vmul.f32 0.5, %v598_v58 }
 0x764   :  { %v268_v60 = vadd.f32 0.5, %v267_v59 }
 0x766   :  { %v272_v0 = vmul.f32 %v270_v63, %v268_v60 }
 0x7d4   :  { %v275_v61 = vpop.permute.xlu0 %274 }
 0x7d5   :  { %v277_v62 = vmul.f32 %v275_v61, %v268_v60 }
 0x7d7   :  { %279 = vrot.lane.b32.xlu1 %v277_v62, %s619_s28 }
 0x849   :  { %v280_v1 = vpop.permute.xlu1 %279 }
 0x84a   :  { %v282_v2 = vadd.f32 %v280_v1, %v272_v0 }
 0x84c   :  { %599 = vtanh.f32 %v282_v2  ;;  %v327_v19 = vrot.slane %v282_v2, 6 }
 0x852   :  { %v600_v3 = vpop.eup %599 }
 0x853   :  { %285 = vrot.lane.b32.xlu2 %v600_v3, %s620_s3 }
 0x8ad   :  { %v286_v5 = vpop.permute.xlu2 %285 }
 0x8ae   :  { %v705_v6 = vmul.f32 %v286_v5, %v268_v60 }
 0x8b0   :  { %v297_v7 = vrot.slane %v705_v6, 6 }
 0x8b2   :  { %298 = vrot.lane.b32.xlu0 %v297_v7, %s621_s29 }
 0x924   :  { %v299_v9 = vpop.permute.xlu0 %298 }
 0x925   :  { %572 = vmatmul.msk.f32.vlgmr.msra.gmra.mxu2 %vm67_vm3, %v299_v9 }
 0x9a8   :  { %v319_v12 = vpop.f32.mrf.mxu2 }
 0x9a9   :  { %v322_v13 = vadd.f32 %v319_v12, %v715_v11 }
 0x9ab   :  { %601 = vtanh.f32 %v322_v13 }
 0x9b1   :  { %v602_v14 = vpop.eup %601 }
 0x9b2   :  { %331 = vrot.lane.b32.xlu1 %v602_v14, %s618_s2  ;;  %v324_v15 = vmul.f32 0.5, %v602_v14 }
 0x9b4   :  { %v325_v16 = vadd.f32 0.5, %v324_v15 }
 0x9b6   :  { %v329_v20 = vmul.f32 %v327_v19, %v325_v16 }
 0xa24   :  { %v332_v17 = vpop.permute.xlu1 %331 }
 0xa25   :  { %v334_v18 = vmul.f32 %v332_v17, %v325_v16 }
 0xa27   :  { %336 = vrot.lane.b32.xlu2 %v334_v18, %s619_s28  ;;  %v525_v18 = vld [vmem:[%s777_s4] sm:$0xff] }
 0xa28   :  { %551 = vmatpush.msrb.mxu2 %v525_v18 }
 0xa81   :  { %v337_v21 = vpop.permute.xlu2 %336 }
 0xa82   :  { %v339_v22 = vadd.f32 %v337_v21, %v329_v20 }
 0xa84   :  { %603 = vtanh.f32 %v339_v22  ;;  %v382_v34 = vrot.slane %v339_v22, 6 }
 0xa8a   :  { %v604_v4 = vpop.eup %603 }
 0xa8b   :  { %342 = vrot.lane.b32.xlu0 %v604_v4, %s620_s3 }
 0xafd   :  { %v343_v23 = vpop.permute.xlu0 %342 }
 0xafe   :  { %v345_v24 = vmul.f32 %v343_v23, %v325_v16 }
 0xb00   :  { %347 = vrot.lane.b32.xlu1 %v345_v24, %s621_s29 }
 0xb72   :  { %v722_v25 = vpop.permute.xlu1 %347 }
 0xb73   :  { %573 = vmatmul.msk.f32.vlgmr.msra.gmra.mxu3 %vm67_vm3, %v722_v25 }
 0xbf6   :  { %v371_v26 = vpop.f32.mrf.mxu3 }
 0xbf7   :  { %v375_v27 = vrot.slane %v371_v26, 6 }
 0xbf9   :  { %v377_v28 = vadd.f32 %v375_v27, %v715_v11 }
 0xbfb   :  { %605 = vtanh.f32 %v377_v28 }
 0xc01   :  { %v606_v29 = vpop.eup %605 }
 0xc02   :  { %386 = vrot.lane.b32.xlu2 %v606_v29, %s618_s2  ;;  %v379_v30 = vmul.f32 0.5, %v606_v29 }
 0xc04   :  { %v380_v31 = vadd.f32 0.5, %v379_v30 }
 0xc06   :  { %v384_v36 = vmul.f32 %v382_v34, %v380_v31 }
 0xc5c   :  { %v387_v32 = vpop.permute.xlu2 %386 }
 0xc5d   :  { %v389_v33 = vmul.f32 %v387_v32, %v380_v31 }
 0xc5f   :  { %391 = vrot.lane.b32.xlu0 %v389_v33, %s619_s28 }
 0xcd1   :  { %v392_v37 = vpop.permute.xlu0 %391 }
 0xcd2   :  { %v394_v38 = vadd.f32 %v392_v37, %v384_v36 }
 0xcd4   :  { %607 = vtanh.f32 %v394_v38  ;;  %v440_v53 = vrot.slane %v394_v38, 6 }
 0xcda   :  { %v608_v39 = vpop.eup %607 }
 0xcdb   :  { %397 = vrot.lane.b32.xlu1 %v608_v39, %s620_s3 }
 0xd4d   :  { %v398_v40 = vpop.permute.xlu1 %397 }
 0xd4e   :  { %v400_v41 = vmul.f32 %v398_v40, %v380_v31 }
 0xd50   :  { %v407_v42 = vrot.slane %v400_v41, 2 }
 0xd52   :  { %408 = vrot.lane.b32.xlu2 %v407_v42, %s621_s29 }
 0xdac   :  { %v409_v43 = vpop.permute.xlu2 %408 }
 0xdad   :  { %574 = vmatmul.msk.f32.vlgmr.msrb.gmra.mxu0 %vm67_vm3, %v409_v43 }
 0xe2a   :  { %v429_v44 = vpop.f32.mrf.mxu0 }
 0xe2b   :  { %v433_v45 = vrot.slane %v429_v44, 4 }
 0xe2d   :  { %v435_v46 = vadd.f32 %v433_v45, %v715_v11 }
 0xe2f   :  { %609 = vtanh.f32 %v435_v46 }
 0xe35   :  { %v610_v47 = vpop.eup %609 }
 0xe36   :  { %444 = vrot.lane.b32.xlu0 %v610_v47, %s618_s2  ;;  %v437_v48 = vmul.f32 0.5, %v610_v47 }
 0xe38   :  { %v438_v49 = vadd.f32 0.5, %v437_v48 }
 0xe3a   :  { %v442_v54 = vmul.f32 %v440_v53, %v438_v49 }
 0xea8   :  { %v445_v50 = vpop.permute.xlu0 %444 }
 0xea9   :  { %v447_v51 = vmul.f32 %v445_v50, %v438_v49 }
 0xeab   :  { %449 = vrot.lane.b32.xlu1 %v447_v51, %s619_s28 }
 0xf1d   :  { %v450_v55 = vpop.permute.xlu1 %449 }
 0xf1e   :  { %v452_v56 = vadd.f32 %v450_v55, %v442_v54 }
 0xf20   :  { %611 = vtanh.f32 %v452_v56 }
 0xf26   :  { %v612_v57 = vpop.eup %611 }
 0xf27   :  { %455 = vrot.lane.b32.xlu2 %v612_v57, %s620_s3 }
 0xf81   :  { %v456_v58 = vpop.permute.xlu2 %455 }
 0xf82   :  { %v458_v59 = vmul.f32 %v456_v58, %v438_v49 }
 0xf84   :  { %v465_v60 = vrot.slane %v458_v59, 4 }
 0xf86   :  { %466 = vrot.lane.b32.xlu0 %v465_v60, %s621_s29 }
 0xff8   :  { %v467_v61 = vpop.permute.xlu0 %466 }
 0xff9   :  { %575 = vmatmul.msk.f32.vlgmr.msra.gmra.mxu1 %vm67_vm3, %v467_v61 }
0x1076   :  { %v487_v62 = vpop.f32.mrf.mxu1 }
0x1077   :  { %v491_v63 = vrot.slane %v487_v62, 2 }
0x1079   :  { %v493_v0 = vadd.f32 %v491_v63, %v715_v11 }
0x107b   :  { %613 = vtanh.f32 %v493_v0 }
0x1081   :  { %v614_v1 = vpop.eup %613 }
0x1082   :  { %502 = vrot.lane.b32.xlu1 %v614_v1, %s618_s2  ;;  %v495_v2 = vmul.f32 0.5, %v614_v1 }
0x1084   :  { %v496_v3 = vadd.f32 0.5, %v495_v2 }
0x108a   :  { %170 = vrot.lane.b32.xlu1 %v687_v35, %s621_s29  ;;  %v498_v35 = vrot.slane %v452_v56, 6 }
0x108c   :  { %v500_v9 = vmul.f32 %v498_v35, %v496_v3 }
0x1092   :  { %402 = vrot.lane.b32.xlu1 %v400_v41, %s621_s29 }
0x10f4   :  { %v503_v5 = vpop.permute.xlu1 %502 }
0x10f5   :  { %v505_v7 = vmul.f32 %v503_v5, %v496_v3 }
0x10f7   :  { %507 = vrot.lane.b32.xlu2 %v505_v7, %s619_s28 }
0x10fc   :  { %v171_v8 = vpop.permute.xlu1 %170 }
0x10fd   :  { %174 = vst.msk [vmem:[#allocation2] sm:$0xc] %vm173_vm5, %v171_v8 }
0x10fe   :  { %176 = vst.msk [vmem:[#allocation2 + $0xa] sm:$0xc] %vm175_vm6, %v171_v8 }
0x10ff   :  { %230 = vrot.lane.b32.xlu2 %v696_v52, %s621_s29 }
0x1104   :  { %v403_v14 = vpop.permute.xlu1 %402 }
0x1107   :  { %460 = vrot.lane.b32.xlu2 %v458_v59, %s621_s29 }
0x1151   :  { %v508_v10 = vpop.permute.xlu2 %507 }
0x1152   :  { %v510_v11 = vadd.f32 %v508_v10, %v500_v9 }
0x1154   :  { %615 = vtanh.f32 %v510_v11 }
0x1159   :  { %v231_v12 = vpop.permute.xlu2 %230 }
0x115a   :  { %v616_v13 = vpop.eup %615  ;;  %234 = vst.msk [vmem:[#allocation2] sm:$0x30] %vm233_vm7, %v231_v12 }
0x115b   :  { %236 = vst.msk [vmem:[#allocation2 + $0x6] sm:$0x30] %vm235_vm8, %v231_v12  ;;  %513 = vrot.lane.b32.xlu0 %v616_v13, %s620_s3 }
0x115c   :  { %405 = vst.msk [vmem:[#allocation2 + $0x8] sm:$0xc] %vm173_vm5, %v403_v14 }
0x115d   :  { %406 = vst.msk [vmem:[#allocation2 + $0x2] sm:$0xc] %vm175_vm6, %v403_v14 }
0x1161   :  { %v461_v52 = vpop.permute.xlu2 %460 }
0x1162   :  { %463 = vst.msk [vmem:[#allocation2 + $0x8] sm:$0x30] %vm233_vm7, %v461_v52 }
0x1163   :  { %464 = vst.msk [vmem:[#allocation2 - $0x2] sm:$0x30] %vm235_vm8, %v461_v52  ;;  %290 = vrot.lane.b32.xlu0 %v705_v6, %s621_s29  ;;  %v11_v6 = vstv %s778_s5 }
0x1164   :  { %12 = vst [vmem:[#allocation3] sm:$0x1] %v11_v6 }
0x116b   :  { %v584_v22 = vld [vmem:[#allocation3] ss:$0 sm:$0xff] }
0x11cd   :  { %v514_v15 = vpop.permute.xlu0 %513 }
0x11ce   :  { %v516_v16 = vmul.f32 %v514_v15, %v496_v3 }
0x11d0   :  { %518 = vrot.lane.b32.xlu0 %v516_v16, %s621_s29 }
0x11d5   :  { %v291_v17 = vpop.permute.xlu0 %290 }
0x11d6   :  { %294 = vst.msk [vmem:[#allocation2] sm:$0xc0] %vm293_vm9, %v291_v17 }
0x11d7   :  { %296 = vst.msk [vmem:[#allocation2 + $0x2] sm:$0xc0] %vm295_vm10, %v291_v17 }
0x11d8   :  { %350 = vst.msk [vmem:[#allocation2 + $0x8] sm:$0x3] %vm116_vm2, %v722_v25 }
0x11d9   :  { %351 = vst.msk [vmem:[#allocation2 + $0x6] sm:$0x3] %vm118_vm4, %v722_v25 }
0x1242   :  { %v519_v19 = vpop.permute.xlu0 %518 }
0x1243   :  { %521 = vst.msk [vmem:[#allocation2 + $0x8] sm:$0xc0] %vm293_vm9, %v519_v19 }
0x1244   :  { %522 = vst.msk [vmem:[#allocation2 - $0x6] sm:$0xc0] %vm295_vm10, %v519_v19 }
0x124a   :  { %v524_v21 = vld [vmem:[#allocation2 + $0x8] sm:$0xff] }
0x124b   :  { %v523_v20 = vld [vmem:[#allocation2] sm:$0xff] }
0x124c   :  { %576 = vmatmul.msk.f32.vlgmr.msrb.gmra.mxu2 %vm67_vm3, %v523_v20 }
0x1254   :  { %577 = vmatmul.msk.f32.gmra.mxu2 %vm67_vm3, %v524_v21 }
0x12cf   :  { %v553_v4 = vpop.f32.mrf.mxu2 }
0x12d0   :  { %v554_v23 = vadd.f32 %v584_v22, %v553_v4 }
0x12d2   :  { %560 = vst.msk [vmem:[%s779_s6] sm:$0xff] %vm559_vm11, %v554_v23 }
0x12d7   :  { %v556_v24 = vpop.f32.mrf.mxu2 }
0x12d8   :  { %v557_v25 = vadd.f32 %v584_v22, %v556_v24 }
0x12da   :  { %561 = vst.msk [vmem:[%s779_s6 + $0x8] sm:$0xff] %vm559_vm11, %v557_v25 }

</bundles_post_ra>
